<compile_context>
chip_gen: v6e
topology: v6e:2x2x1
jax: 0.10.0
libtpu: 0.0.40
codegen_flags: <defaults>
</compile_context>

<pallas_src>
import jax
import jax.numpy as jnp
import numpy as np
from jax.experimental import pallas as pl
from jax.experimental.pallas import tpu as pltpu


def _round_up(x, m):
    return ((x + m - 1) // m) * m


# -----------------------------------------------------------------------------
# Kernel
# -----------------------------------------------------------------------------
def fusion_kernel(img_ref, csv_ref, w_ref, vec_ref, o_ref):
    """img_ref: (TB, img_dim) f32    csv_ref: (TB, csv_dim) f32
    w_ref:  (img_dim+csv_dim + E + 2E, 2E) packed weights (compute dtype)
            rows [0, img_dim)         : img-branch pre-LN weight  [Wip | Wip Wv2 Wo2]
            rows [img_dim, IN)        : csv-branch pre-LN weight  [Wcp Wv1 Wo1 | Wcp]
            rows [IN, IN+E)           : FFN w1 (E, 2E)
            rows [IN+E, IN+3E)        : FFN w2 (2E, E), zero-padded to 2E cols
    vec_ref: (8, 2E) f32 packed vectors
            row 0 = [b1_tot | b2_tot], row 1 = [gamma1 | gamma2],
            row 2 = [beta1 | beta2],   row 3 = ffn bias1 (2E),
            row 4 = [ffn bias2 | 0]    (rows 5..7 unused)
    o_ref:  (TB, E)
    """
    f32 = jnp.float32
    img_dim = img_ref.shape[-1]
    csv_dim = csv_ref.shape[-1]
    IN = img_dim + csv_dim
    E = o_ref.shape[-1]
    wdt = w_ref.dtype

    # Both pre-LayerNorm branches from two accumulated MXU dots (no host concat):
    #   [preLN1 | preLN2] = img @ W[0:img_dim] + csv @ W[img_dim:IN] + bias
    pre = jnp.dot(img_ref[...].astype(wdt), w_ref[0:img_dim, :],
                  preferred_element_type=f32)
    pre = pre + jnp.dot(csv_ref[...].astype(wdt), w_ref[img_dim:IN, :],
                        preferred_element_type=f32)
    pre = pre + vec_ref[0:1, :]

    gamma = vec_ref[1:2, :]
    beta = vec_ref[2:3, :]

    def layernorm(x, g, b):
        mu = jnp.mean(x, axis=-1, keepdims=True)
        var = jnp.mean(jnp.square(x - mu), axis=-1, keepdims=True)
        return (x - mu) * jax.lax.rsqrt(var + 1e-5) * g + b

    a1 = layernorm(pre[:, :E], gamma[:, :E], beta[:, :E])
    a2 = layernorm(pre[:, E:], gamma[:, E:], beta[:, E:])
    fused = a1 + a2

    # FFN: Linear(E, 2E) -> ReLU -> Linear(2E, E); MXU in weight dtype, f32 acc.
    h = jnp.dot(fused.astype(wdt), w_ref[IN:IN + E, :],
                preferred_element_type=f32)
    h = jnp.maximum(h + vec_ref[3:4, :], 0.0)
    out = jnp.dot(h.astype(wdt), w_ref[IN + E:IN + 3 * E, :E],
                  preferred_element_type=f32)
    out = out + vec_ref[4:5, :E]
    o_ref[...] = out.astype(o_ref.dtype)


# -----------------------------------------------------------------------------
# Wrapper
# -----------------------------------------------------------------------------
def cross_attention_fusion(img_features, csv_features, folded, *,
                           batch_tile=8192, out_dtype=jnp.float32):
    """Fused forward. `folded` comes from fold_params().

    Streams img/csv activations directly from HBM (no concat / cast / pad
    materialization in the wrapper); weights are resident in VMEM.
    """
    # The softmax==1 reduction is exact only because the module feeds
    # seq_len == 1 (it unsqueezes a length-1 axis); enforce that contract.
    assert img_features.ndim == 2 and csv_features.ndim == 2, (
        "kernel implements the seq_len==1 forward on (B, dim) inputs")

    w_slab = folded["w_slab"]
    vec_pack = folded["vec_pack"]
    img_dim = folded["img_dim"]
    csv_dim = folded["csv_dim"]
    E = folded["embed_dim"]
    assert img_features.shape[1] == img_dim and csv_features.shape[1] == csv_dim

    B = img_features.shape[0]

    # --- batch tile selection -------------------------------------------------
    # Round the user tile to a multiple of 8 (sublane rule), then pick a tile
    # that (a) amortizes the ~0.35 us per-grid-step overhead and (b) keeps >= 2
    # (ideally 4+) grid steps for large B so v7x's 2 TensorCores both work via
    # dimension_semantics=("parallel",).
    batch_tile = max(8, _round_up(int(batch_tile), 8))
    b_ceil = _round_up(B, 8)
    if b_ceil > batch_tile:
        tb = min(batch_tile, _round_up(pl.cdiv(b_ceil, 4), 8))   # >= 4 steps
    elif b_ceil >= 1024:
        tb = min(batch_tile, _round_up(pl.cdiv(b_ceil, 2), 8))   # 2 steps (megacore)
    else:
        tb = min(batch_tile, b_ceil)                             # tiny-B latency: 1 step
    grid = (pl.cdiv(B, tb),)

    # NOTE: no wrapper-side padding — partial final blocks are masked by Pallas;
    # LayerNorm/matmul are row-local so OOB rows never contaminate valid rows.
    out = pl.pallas_call(
        fusion_kernel,
        out_shape=jax.ShapeDtypeStruct((B, E), out_dtype),
        grid=grid,
        in_specs=[
            pl.BlockSpec((tb, img_dim), lambda i: (i, 0)),    # streamed raw activations
            pl.BlockSpec((tb, csv_dim), lambda i: (i, 0)),    # streamed raw activations
            pl.BlockSpec(w_slab.shape, lambda i: (0, 0)),     # resident packed weights
            pl.BlockSpec(vec_pack.shape, lambda i: (0, 0)),   # resident packed vectors
        ],
        out_specs=pl.BlockSpec((tb, E), lambda i: (i, 0)),
        compiler_params=pltpu.CompilerParams(
            dimension_semantics=("parallel",),                # megacore shard on v7x
            vmem_limit_bytes=32 * 1024 * 1024,
        ),
    )(img_features, csv_features, w_slab, vec_pack)
    return out


# -----------------------------------------------------------------------------
# Parameters (module-shaped) + host-side algebraic folding / packing
# -----------------------------------------------------------------------------
def make_params(key, img_dim, csv_dim, embed_dim):
    """Deterministic synthetic parameters matching the nn.Module's shapes.

    Linear weights are stored pre-transposed as (in_dim, out_dim) so math is
    x @ W; biases are (1, out_dim).
    """
    E = embed_dim
    keys = jax.random.split(key, 16)

    def w(k, shape, scale):
        return jax.random.uniform(k, shape, jnp.float32, -1.0, 1.0) * scale

    return {
        "wip": w(keys[0], (img_dim, E), 1.0 / np.sqrt(img_dim)),
        "bip": w(keys[1], (1, E), 1.0 / np.sqrt(img_dim)),
        "wcp": w(keys[2], (csv_dim, E), 1.0 / np.sqrt(csv_dim)),
        "bcp": w(keys[3], (1, E), 1.0 / np.sqrt(csv_dim)),
        # MultiheadAttention 1: value slice of in_proj + out_proj
        "wv1": w(keys[4], (E, E), 1.0 / np.sqrt(E)),
        "bv1": w(keys[5], (1, E), 1.0 / np.sqrt(E)),
        "wo1": w(keys[6], (E, E), 1.0 / np.sqrt(E)),
        "bo1": w(keys[7], (1, E), 1.0 / np.sqrt(E)),
        # MultiheadAttention 2
        "wv2": w(keys[8], (E, E), 1.0 / np.sqrt(E)),
        "bv2": w(keys[9], (1, E), 1.0 / np.sqrt(E)),
        "wo2": w(keys[10], (E, E), 1.0 / np.sqrt(E)),
        "bo2": w(keys[11], (1, E), 1.0 / np.sqrt(E)),
        # LayerNorms
        "g1": jnp.ones((1, E), jnp.float32),
        "be1": jnp.zeros((1, E), jnp.float32),
        "g2": jnp.ones((1, E), jnp.float32),
        "be2": jnp.zeros((1, E), jnp.float32),
        # FFN
        "wf1": w(keys[12], (E, 2 * E), 1.0 / np.sqrt(E)),
        "bf1": w(keys[13], (1, 2 * E), 1.0 / np.sqrt(E)),
        "wf2": w(keys[14], (2 * E, E), 1.0 / np.sqrt(2 * E)),
        "bf2": w(keys[15], (1, E), 1.0 / np.sqrt(2 * E)),
    }


def fold_params(p, compute_dtype=jnp.float32):
    """Fold the (linear) attention chain into the projections and pack operands.

    Runs once per parameter set on the host; per-call cost is zero.
    On v5e keep compute_dtype=float32 (no bf16 VPU benefit, MXU time is tiny);
    bf16 is an option on v6e/v7x if its accuracy is acceptable downstream.
    """
    img_dim = p["wip"].shape[0]
    csv_dim = p["wcp"].shape[0]
    E = p["wip"].shape[1]

    # attn1(query=img, kv=csv) -> out_proj1(v_proj1(csv_emb)); fold into csv path.
    A1 = p["wcp"] @ p["wv1"] @ p["wo1"]                                    # (csv_dim, E)
    b1_tot = p["bip"] + p["bcp"] @ p["wv1"] @ p["wo1"] + p["bv1"] @ p["wo1"] + p["bo1"]
    # attn2(query=csv, kv=img) -> out_proj2(v_proj2(img_emb)); fold into img path.
    A2 = p["wip"] @ p["wv2"] @ p["wo2"]                                    # (img_dim, E)
    b2_tot = p["bcp"] + p["bip"] @ p["wv2"] @ p["wo2"] + p["bv2"] @ p["wo2"] + p["bo2"]

    # Single resident weight slab (rows are all multiples of 8 for these dims):
    #   [ img-branch (img_dim, 2E) ]    img @ this  -> [preLN1_img | preLN2_img]
    #   [ csv-branch (csv_dim, 2E) ]    csv @ this  -> [preLN1_csv | preLN2_csv]
    #   [ FFN w1     (E, 2E)       ]
    #   [ FFN w2     (2E, 2E) pad  ]    valid cols [:E]
    w_img = jnp.concatenate([p["wip"], A2], axis=1)     # (img_dim, 2E)
    w_csv = jnp.concatenate([A1, p["wcp"]], axis=1)     # (csv_dim, 2E)
    wf2_pad = jnp.pad(p["wf2"], ((0, 0), (0, E)))        # (2E, 2E)
    w_slab = jnp.concatenate([w_img, w_csv, p["wf1"], wf2_pad],
                             axis=0).astype(compute_dtype)

    # Packed small vectors (kept f32: biases / LN params are VPU-side math).
    vec_pack = jnp.zeros((8, 2 * E), jnp.float32)
    vec_pack = vec_pack.at[0].set(jnp.concatenate([b1_tot, b2_tot], axis=-1)[0])
    vec_pack = vec_pack.at[1].set(jnp.concatenate([p["g1"], p["g2"]], axis=-1)[0])
    vec_pack = vec_pack.at[2].set(jnp.concatenate([p["be1"], p["be2"]], axis=-1)[0])
    vec_pack = vec_pack.at[3].set(p["bf1"][0])
    vec_pack = vec_pack.at[4, :E].set(p["bf2"][0])

    return {
        "w_slab": w_slab,
        "vec_pack": vec_pack,
        "img_dim": img_dim,
        "csv_dim": csv_dim,
        "embed_dim": E,
    }


# -----------------------------------------------------------------------------
# Pure-JAX reference of the PyTorch forward (eval mode), unfused math.
# -----------------------------------------------------------------------------
def reference_forward(img, csv, p):
    def ln(x, g, b):
        mu = jnp.mean(x, axis=-1, keepdims=True)
        var = jnp.mean((x - mu) ** 2, axis=-1, keepdims=True)
        return (x - mu) * jax.lax.rsqrt(var + 1e-5) * g + b

    img_emb = img @ p["wip"] + p["bip"]
    csv_emb = csv @ p["wcp"] + p["bcp"]
    attn1 = (csv_emb @ p["wv1"] + p["bv1"]) @ p["wo1"] + p["bo1"]
    a1 = ln(img_emb + attn1, p["g1"], p["be1"])
    attn2 = (img_emb @ p["wv2"] + p["bv2"]) @ p["wo2"] + p["bo2"]
    a2 = ln(csv_emb + attn2, p["g2"], p["be2"])
    fused = a1 + a2
    h = jnp.maximum(fused @ p["wf1"] + p["bf1"], 0.0)
    return h @ p["wf2"] + p["bf2"]


if __name__ == "__main__":
    B, IMG_DIM, CSV_DIM, EMBED_DIM = 8, 64, 48, 32

    key = jax.random.PRNGKey(0)
    k_img, k_csv, k_params = jax.random.split(key, 3)
    img_features = jax.random.normal(k_img, (B, IMG_DIM), jnp.float32)
    csv_features = jax.random.normal(k_csv, (B, CSV_DIM), jnp.float32)
    params = make_params(k_params, IMG_DIM, CSV_DIM, EMBED_DIM)
    ref = np.asarray(reference_forward(img_features, csv_features, params))

    # f32 path (tight check; host folding only changes rounding order slightly).
    folded_f32 = fold_params(params, compute_dtype=jnp.float32)
    out_f32 = jax.block_until_ready(
        cross_attention_fusion(img_features, csv_features, folded_f32))
    np.testing.assert_allclose(np.asarray(out_f32), ref, rtol=1e-4, atol=1e-4)

    # Non-multiple-of-8 batch with a multi-step grid: exercises the no-pad
    # partial-final-block path (OOB reads row-local, OOB writes masked).
    B2 = 20
    img2 = jax.random.normal(jax.random.PRNGKey(1), (B2, IMG_DIM), jnp.float32)
    csv2 = jax.random.normal(jax.random.PRNGKey(2), (B2, CSV_DIM), jnp.float32)
    ref2 = np.asarray(reference_forward(img2, csv2, params))
    out2 = jax.block_until_ready(
        cross_attention_fusion(img2, csv2, folded_f32, batch_tile=8))
    np.testing.assert_allclose(np.asarray(out2), ref2, rtol=1e-4, atol=1e-4)

    # bf16 weight + bf16 writeback path (v6e / v7x); streamed activations stay
    # raw f32 (cast happens in-kernel); elementwise math stays f32.
    folded_bf16 = fold_params(params, compute_dtype=jnp.bfloat16)
    out_bf16 = jax.block_until_ready(
        cross_attention_fusion(img_features, csv_features, folded_bf16,
                               out_dtype=jnp.bfloat16))
    np.testing.assert_allclose(np.asarray(out_bf16, dtype=np.float32), ref,
                               rtol=1e-1, atol=1e-1)

    print("KERNEL_OK")
</pallas_src>

<mosaic_0001>
module attributes {stable_mosaic.version = 11 : i64} {
  func.func @fusion_kernel(%arg0: i32, %arg1: memref<8x64xf32, #tpu.memory_space<vmem>>, %arg2: memref<8x48xf32, #tpu.memory_space<vmem>>, %arg3: memref<208x64xf32, #tpu.memory_space<vmem>>, %arg4: memref<8x64xf32, #tpu.memory_space<vmem>>, %arg5: memref<8x32xf32, #tpu.memory_space<vmem>>) attributes {dimension_semantics = [#tpu.dimension_semantics<parallel>], iteration_bounds = array<i64: 1>, scalar_prefetch = 0 : i64, scratch_operands = 0 : i64, tpu.core_type = #tpu.core_type<tc>, window_params = [{transform_indices = @transform_0, window_bounds = array<i64: 8, 64>}, {transform_indices = @transform_1, window_bounds = array<i64: 8, 48>}, {pipeline_mode = #tpu.pipeline_mode<synchronous>, transform_indices = @transform_2, window_bounds = array<i64: 208, 64>}, {pipeline_mode = #tpu.pipeline_mode<synchronous>, transform_indices = @transform_3, window_bounds = array<i64: 8, 64>}, {transform_indices = @transform_4, window_bounds = array<i64: 8, 32>}]} {
    %c0 = arith.constant 0 : index
    %c0_0 = arith.constant 0 : index
    %0 = vector.load %arg1[%c0, %c0_0] : memref<8x64xf32, #tpu.memory_space<vmem>>, vector<8x64xf32>
    %c0_1 = arith.constant 0 : index
    %c0_2 = arith.constant 0 : index
    %1 = vector.load %arg3[%c0_1, %c0_2] : memref<208x64xf32, #tpu.memory_space<vmem>>, vector<64x64xf32>
    %cst = arith.constant dense<0.000000e+00> : vector<8x64xf32>
    %2 = tpu.matmul %0, %1, %cst {dimension_numbers = #tpu.dot_dimension_numbers<[1], [0], [0], [1], [0, 0, 1, 1], [], []>} : vector<8x64xf32>, vector<64x64xf32>, vector<8x64xf32> -> vector<8x64xf32>
    %c0_3 = arith.constant 0 : index
    %c0_4 = arith.constant 0 : index
    %3 = vector.load %arg2[%c0_3, %c0_4] : memref<8x48xf32, #tpu.memory_space<vmem>>, vector<8x48xf32>
    %c64 = arith.constant 64 : index
    %c0_5 = arith.constant 0 : index
    %4 = vector.load %arg3[%c64, %c0_5] : memref<208x64xf32, #tpu.memory_space<vmem>>, vector<48x64xf32>
    %cst_6 = arith.constant dense<0.000000e+00> : vector<8x64xf32>
    %5 = tpu.matmul %3, %4, %cst_6 {dimension_numbers = #tpu.dot_dimension_numbers<[1], [0], [0], [1], [0, 0, 1, 1], [], []>} : vector<8x48xf32>, vector<48x64xf32>, vector<8x64xf32> -> vector<8x64xf32>
    %6 = arith.addf %2, %5 : vector<8x64xf32>
    %c0_7 = arith.constant 0 : index
    %c0_8 = arith.constant 0 : index
    %7 = vector.load %arg4[%c0_7, %c0_8] : memref<8x64xf32, #tpu.memory_space<vmem>>, vector<1x64xf32>
    %8 = vector.broadcast %7 : vector<1x64xf32> to vector<8x64xf32>
    %9 = arith.addf %6, %8 : vector<8x64xf32>
    %c1 = arith.constant 1 : index
    %c0_9 = arith.constant 0 : index
    %10 = vector.load %arg4[%c1, %c0_9] : memref<8x64xf32, #tpu.memory_space<vmem>>, vector<1x64xf32>
    %c2 = arith.constant 2 : index
    %c0_10 = arith.constant 0 : index
    %11 = vector.load %arg4[%c2, %c0_10] : memref<8x64xf32, #tpu.memory_space<vmem>>, vector<1x64xf32>
    %12 = vector.extract_strided_slice %9 {offsets = [0, 0], sizes = [8, 32], strides = [1, 1]} : vector<8x64xf32> to vector<8x32xf32>
    %13 = vector.extract_strided_slice %10 {offsets = [0, 0], sizes = [1, 32], strides = [1, 1]} : vector<1x64xf32> to vector<1x32xf32>
    %14 = vector.extract_strided_slice %11 {offsets = [0, 0], sizes = [1, 32], strides = [1, 1]} : vector<1x64xf32> to vector<1x32xf32>
    %cst_11 = arith.constant dense<0.000000e+00> : vector<8xf32>
    %15 = vector.multi_reduction <add>, %12, %cst_11 [1] : vector<8x32xf32> to vector<8xf32>
    %16 = vector.shape_cast %15 : vector<8xf32> to vector<8x1xf32>
    %cst_12 = arith.constant 3.200000e+01 : f32
    %17 = vector.broadcast %cst_12 : f32 to vector<8x1xf32>
    %18 = arith.divf %16, %17 : vector<8x1xf32>
    %19 = vector.broadcast %18 : vector<8x1xf32> to vector<8x32xf32>
    %20 = arith.subf %12, %19 : vector<8x32xf32>
    %21 = arith.mulf %20, %20 : vector<8x32xf32>
    %cst_13 = arith.constant dense<0.000000e+00> : vector<8xf32>
    %22 = vector.multi_reduction <add>, %21, %cst_13 [1] : vector<8x32xf32> to vector<8xf32>
    %23 = vector.shape_cast %22 : vector<8xf32> to vector<8x1xf32>
    %cst_14 = arith.constant 3.200000e+01 : f32
    %24 = vector.broadcast %cst_14 : f32 to vector<8x1xf32>
    %25 = arith.divf %23, %24 : vector<8x1xf32>
    %26 = vector.broadcast %18 : vector<8x1xf32> to vector<8x32xf32>
    %27 = arith.subf %12, %26 : vector<8x32xf32>
    %cst_15 = arith.constant 9.99999974E-6 : f32
    %28 = vector.broadcast %cst_15 : f32 to vector<8x1xf32>
    %29 = arith.addf %25, %28 : vector<8x1xf32>
    %30 = math.rsqrt %29 : vector<8x1xf32>
    %31 = vector.broadcast %30 : vector<8x1xf32> to vector<8x32xf32>
    %32 = arith.mulf %27, %31 : vector<8x32xf32>
    %33 = vector.broadcast %13 : vector<1x32xf32> to vector<8x32xf32>
    %34 = arith.mulf %32, %33 : vector<8x32xf32>
    %35 = vector.broadcast %14 : vector<1x32xf32> to vector<8x32xf32>
    %36 = arith.addf %34, %35 : vector<8x32xf32>
    %37 = vector.extract_strided_slice %9 {offsets = [0, 32], sizes = [8, 32], strides = [1, 1]} : vector<8x64xf32> to vector<8x32xf32>
    %38 = vector.extract_strided_slice %10 {offsets = [0, 32], sizes = [1, 32], strides = [1, 1]} : vector<1x64xf32> to vector<1x32xf32>
    %39 = vector.extract_strided_slice %11 {offsets = [0, 32], sizes = [1, 32], strides = [1, 1]} : vector<1x64xf32> to vector<1x32xf32>
    %cst_16 = arith.constant dense<0.000000e+00> : vector<8xf32>
    %40 = vector.multi_reduction <add>, %37, %cst_16 [1] : vector<8x32xf32> to vector<8xf32>
    %41 = vector.shape_cast %40 : vector<8xf32> to vector<8x1xf32>
    %cst_17 = arith.constant 3.200000e+01 : f32
    %42 = vector.broadcast %cst_17 : f32 to vector<8x1xf32>
    %43 = arith.divf %41, %42 : vector<8x1xf32>
    %44 = vector.broadcast %43 : vector<8x1xf32> to vector<8x32xf32>
    %45 = arith.subf %37, %44 : vector<8x32xf32>
    %46 = arith.mulf %45, %45 : vector<8x32xf32>
    %cst_18 = arith.constant dense<0.000000e+00> : vector<8xf32>
    %47 = vector.multi_reduction <add>, %46, %cst_18 [1] : vector<8x32xf32> to vector<8xf32>
    %48 = vector.shape_cast %47 : vector<8xf32> to vector<8x1xf32>
    %cst_19 = arith.constant 3.200000e+01 : f32
    %49 = vector.broadcast %cst_19 : f32 to vector<8x1xf32>
    %50 = arith.divf %48, %49 : vector<8x1xf32>
    %51 = vector.broadcast %43 : vector<8x1xf32> to vector<8x32xf32>
    %52 = arith.subf %37, %51 : vector<8x32xf32>
    %cst_20 = arith.constant 9.99999974E-6 : f32
    %53 = vector.broadcast %cst_20 : f32 to vector<8x1xf32>
    %54 = arith.addf %50, %53 : vector<8x1xf32>
    %55 = math.rsqrt %54 : vector<8x1xf32>
    %56 = vector.broadcast %55 : vector<8x1xf32> to vector<8x32xf32>
    %57 = arith.mulf %52, %56 : vector<8x32xf32>
    %58 = vector.broadcast %38 : vector<1x32xf32> to vector<8x32xf32>
    %59 = arith.mulf %57, %58 : vector<8x32xf32>
    %60 = vector.broadcast %39 : vector<1x32xf32> to vector<8x32xf32>
    %61 = arith.addf %59, %60 : vector<8x32xf32>
    %62 = arith.addf %36, %61 : vector<8x32xf32>
    %c112 = arith.constant 112 : index
    %c0_21 = arith.constant 0 : index
    %63 = vector.load %arg3[%c112, %c0_21] : memref<208x64xf32, #tpu.memory_space<vmem>>, vector<32x64xf32>
    %cst_22 = arith.constant dense<0.000000e+00> : vector<8x64xf32>
    %64 = tpu.matmul %62, %63, %cst_22 {dimension_numbers = #tpu.dot_dimension_numbers<[1], [0], [0], [1], [0, 0, 1, 1], [], []>} : vector<8x32xf32>, vector<32x64xf32>, vector<8x64xf32> -> vector<8x64xf32>
    %c3 = arith.constant 3 : index
    %c0_23 = arith.constant 0 : index
    %65 = vector.load %arg4[%c3, %c0_23] : memref<8x64xf32, #tpu.memory_space<vmem>>, vector<1x64xf32>
    %66 = vector.broadcast %65 : vector<1x64xf32> to vector<8x64xf32>
    %67 = arith.addf %64, %66 : vector<8x64xf32>
    %cst_24 = arith.constant 0.000000e+00 : f32
    %68 = vector.broadcast %cst_24 : f32 to vector<8x64xf32>
    %69 = arith.maximumf %67, %68 : vector<8x64xf32>
    %c144 = arith.constant 144 : index
    %c0_25 = arith.constant 0 : index
    %70 = vector.load %arg3[%c144, %c0_25] : memref<208x64xf32, #tpu.memory_space<vmem>>, vector<64x32xf32>
    %cst_26 = arith.constant dense<0.000000e+00> : vector<8x32xf32>
    %71 = tpu.matmul %69, %70, %cst_26 {dimension_numbers = #tpu.dot_dimension_numbers<[1], [0], [0], [1], [0, 0, 1, 1], [], []>} : vector<8x64xf32>, vector<64x32xf32>, vector<8x32xf32> -> vector<8x32xf32>
    %c4 = arith.constant 4 : index
    %c0_27 = arith.constant 0 : index
    %72 = vector.load %arg4[%c4, %c0_27] : memref<8x64xf32, #tpu.memory_space<vmem>>, vector<1x32xf32>
    %73 = vector.broadcast %72 : vector<1x32xf32> to vector<8x32xf32>
    %74 = arith.addf %71, %73 : vector<8x32xf32>
    %c0_28 = arith.constant 0 : index
    %c0_29 = arith.constant 0 : index
    %75 = vector.load %arg5[%c0_28, %c0_29] : memref<8x32xf32, #tpu.memory_space<vmem>>, vector<8x32xf32>
    tpu.vector_store %arg5[%c0_28, %c0_29], %74 {strides = array<i32>} : memref<8x32xf32, #tpu.memory_space<vmem>>, vector<8x32xf32>,
    return
  }
  func.func @transform_0(%arg0: i32) -> (i32, i32) {
    %c0_i32 = arith.constant 0 : i32
    %c0_i32_0 = arith.constant 0 : i32
    return %arg0, %c0_i32 : i32, i32
  }
  func.func @transform_1(%arg0: i32) -> (i32, i32) {
    %c0_i32 = arith.constant 0 : i32
    %c0_i32_0 = arith.constant 0 : i32
    return %arg0, %c0_i32 : i32, i32
  }
  func.func @transform_2(%arg0: i32) -> (i32, i32) {
    %c0_i32 = arith.constant 0 : i32
    %c0_i32_0 = arith.constant 0 : i32
    %c0_i32_1 = arith.constant 0 : i32
    return %c0_i32, %c0_i32_0 : i32, i32
  }
  func.func @transform_3(%arg0: i32) -> (i32, i32) {
    %c0_i32 = arith.constant 0 : i32
    %c0_i32_0 = arith.constant 0 : i32
    %c0_i32_1 = arith.constant 0 : i32
    return %c0_i32, %c0_i32_0 : i32, i32
  }
  func.func @transform_4(%arg0: i32) -> (i32, i32) {
    %c0_i32 = arith.constant 0 : i32
    %c0_i32_0 = arith.constant 0 : i32
    return %arg0, %c0_i32 : i32, i32
  }
}

</mosaic_0001>

<bundles_post_ra>
// kernel: tpu_custom_call.1
= control target key start
LH: loop header
LB: loop body
LE: loop exit
PB: predicated region body
PF: predicated region fallthrough
CT: control target
= control target key end

     0   :  { %v560_v2 = vmov 0.0   ;;  %s732_s0 = inlined_call_operand.vmem [shape: f32[8,64], index: 0, kind: input, shape index: {}]   ;;  %s733_s1 = inlined_call_operand.vmem [shape: f32[8,48], index: 1, kind: input, shape index: {}]   ;;  %s734_s2 = inlined_call_operand.vmem [shape: f32[208,64], index: 2, kind: input, shape index: {}]   ;;  %s735_s3 = inlined_call_operand.vmem [shape: f32[8,64], index: 3, kind: input, shape index: {}]   ;;  %s736_s4 = inlined_call_operand.hbm [shape: f32[8,32], index: 4, kind: output, shape index: {}]  }
   0x1   :  { %v26_v0 = vld [vmem:[%s734_s2 + $0x38] sm:$0xff]  ;;  %v33_v1 = vld [vmem:[%s734_s2 + $0x68] sm:$0xff]  ;;  %481 = vmatprep.subr.mxu1 %v560_v2  ;;  %466 = vmatprep.subr.mxu0 %v560_v2  ;;  %v25_v3 = vld [vmem:[%s734_s2 + $0x30] sm:$0xff] }
   0x2   :  { %v32_v4 = vld [vmem:[%s734_s2 + $0x60] sm:$0xff]  ;;  %482 = vmatpush3.msra.mxu1 %v26_v0  ;;  %467 = vmatpush3.msra.mxu0 %v33_v1  ;;  %v24_v5 = vld [vmem:[%s734_s2 + $0x28] sm:$0xff]  ;;  %v31_v6 = vld [vmem:[%s734_s2 + $0x58] sm:$0xff] }
   0x3   :  { %483 = vmatprep.subr.mxu1 %v560_v2  ;;  %468 = vmatprep.subr.mxu0 %v560_v2  ;;  %v23_v7 = vld [vmem:[%s734_s2 + $0x20] sm:$0xff]  ;;  %v30_v8 = vld [vmem:[%s734_s2 + $0x50] sm:$0xff] }
   0x4   :  { %484 = vmatpush3.msra.mxu1 %v25_v3  ;;  %469 = vmatpush3.msra.mxu0 %v32_v4 }
   0x5   :  { %485 = vmatprep.subr.mxu1 %v560_v2  ;;  %470 = vmatprep.subr.mxu0 %v560_v2 }
   0x6   :  { %9 = vsyncpa [#allocation3], 0  ;;  %486 = vmatpush3.msra.mxu1 %v24_v5  ;;  %471 = vmatpush3.msra.mxu0 %v31_v6  ;;  %v22_v9 = vld [vmem:[%s734_s2 + $0x18] sm:$0xff]  ;;  %v29_v10 = vld [vmem:[%s734_s2 + $0x48] sm:$0xff]  ;;  %vm34_vm0 = vcmask 392192   ;;  %vm561_vm1 = vmmov 0  }
   0x7   :  { %487 = vmatprep.subr.mxu1 %v560_v2  ;;  %472 = vmatprep.subr.mxu0 %v560_v2  ;;  %v21_v11 = vld [vmem:[%s734_s2 + $0x10] sm:$0xff]  ;;  %v28_v12 = vld [vmem:[%s734_s2 + $0x40] sm:$0xff]  ;;  %v20_v13 = vld [vmem:[%s734_s2 + $0x8] sm:$0xff]  ;;  %vm108_vm2 = vcmask 523264   ;;  %s562_s21 = smov 96   ;;  %vm190_vm3 = vcmask 261120  }
   0x8   :  { %488 = vmatpush3.msra.mxu1 %v23_v7  ;;  %473 = vmatpush3.msra.mxu0 %v30_v8  ;;  %v27_v14 = vld [vmem:[%s733_s1] sm:$0xff]  ;;  %v246_v38 = vld [vmem:[%s734_s2 + $0x88] sm:$0xff]  ;;  %v244_v40 = vld [vmem:[%s734_s2 + $0x78] sm:$0xff]  ;;  %s563_s26 = smov [#allocation2]  }
   0x9   :  { %489 = vmatprep.subr.mxu1 %v560_v2  ;;  %474 = vmatprep.subr.mxu0 %v560_v2  ;;  %v19_v15 = vld [vmem:[%s734_s2] sm:$0xff]  ;;  %v243_v44 = vld [vmem:[%s734_s2 + $0x70] sm:$0xff]  ;;  %v333_v45 = vld [vmem:[%s734_s2 + $0xc8] sm:$0xff]  ;;  %s419_s27 = sshll.u32 %s563_s26, 4  ;;  %s420_s27 = int_to_ptr.vmem [resolvable:$true] %s419_s27 }
   0xa   :  { %490 = vmatpush3.msra.mxu1 %v22_v9  ;;  %475 = vmatpush3.msra.mxu0 %v29_v10  ;;  %v18_v16 = vld [vmem:[%s732_s0] sm:$0xff]  ;;  %v331_v47 = vld [vmem:[%s734_s2 + $0xb8] sm:$0xff]  ;;  %v330_v50 = vld [vmem:[%s734_s2 + $0xb0] sm:$0xff]  ;;  %p543_p1 = scmp.lt.s32.totalorder %s420_s27, %s420_s27 }
   0xb   :  { %491 = vmatprep.subr.mxu1 %v560_v2  ;;  %476 = vmatprep.subr.mxu0 %v560_v2  ;;  %v429_v20 = vld [vmem:[%s735_s3] ss:$0 sm:$0xff]  ;;  %v430_v49 = vld [vmem:[%s735_s3 + $0x1] ss:$0 sm:$0xff]  ;;  %v431_v52 = vld [vmem:[%s735_s3 + $0x2] ss:$0 sm:$0xff] }
   0xc   :  { %492 = vmatpush3.msra.mxu1 %v21_v11  ;;  %477 = vmatpush3.msra.mxu0 %v28_v12  ;;  %v245_v39 = vld [vmem:[%s734_s2 + $0x80] sm:$0xff]  ;;  %v329_v53 = vld [vmem:[%s734_s2 + $0xa8] sm:$0xff]  ;;  %v327_v3 = vld [vmem:[%s734_s2 + $0x98] sm:$0xff] }
   0xd   :  { %493 = vmatprep.subr.mxu1 %v560_v2  ;;  %478 = vmatprep.mubr.msk.f32.mxu0 %vm561_vm1, %v560_v2  ;;  %v332_v46 = vld [vmem:[%s734_s2 + $0xc0] sm:$0xff]  ;;  %v326_v4 = vld [vmem:[%s734_s2 + $0x90] sm:$0xff] }
   0xe   :  { %494 = vmatpush3.msra.mxu1 %v20_v13  ;;  %479 = vmatmul.mubr.msk.f32.vlgmr.msra.gmra.mxu0 %vm34_vm0, %v27_v14  ;;  %v328_v1 = vld [vmem:[%s734_s2 + $0xa0] sm:$0xff]  ;;  %s538_s2 = scalar_lea.vmem %s420_s27, 128 }
   0xf   :  { %495 = vmatprep.subr.mxu1 %v560_v2  ;;  %497 = vmatprep.mubr.msk.f32.mxu1 %vm561_vm1, %v560_v2  ;;  %v432_v5 = vld [vmem:[%s735_s3 + $0x3] ss:$0 sm:$0xff]  ;;  %v434_v10 = vld [vmem:[%s735_s3 + $0x4] ss:$0 sm:$0xff]  ;;  %p539_p0 = scmp.ne.s32.totalorder %s420_s27, %s538_s2  ;;  %p544_p2 = scmp.lt.s32.totalorder %s538_s2, %s538_s2 }
  0x10   :  { %496 = vmatpush3.msra.mxu1 %v19_v15  ;;  %500 = vmatprep.subr.mxu0 %v560_v2 }
  0x11   :  { %498 = vmatmul.mubr.msk.f32.vlgmr.msra.gmra.mxu1 %vm108_vm2, %v18_v16  ;;  %508 = vmatprep.mubr.msk.f32.mxu0 %vm561_vm1, %v560_v2  ;;  %p545_p3 = por %p544_p2, %p543_p1 }
  0x12   :  { %511 = vmatprep.subr.mxu1 %v560_v2  ;;  %527 = vmatprep.mubr.msk.f32.mxu1 %vm561_vm1, %v560_v2 }
  0x13   :  { %501 = vmatpush3.msra.mxu0 %v246_v38  ;;  %512 = vmatpush3.msra.mxu1 %v333_v45  ;;  %p546_p4 = pnand %p545_p3, %p539_p0 }
  0x14   :  { %502 = vmatprep.subr.mxu0 %v560_v2  ;;  %513 = vmatprep.subr.mxu1 %v560_v2 }
  0x15   :  { %503 = vmatpush3.msra.mxu0 %v245_v39  ;;  %514 = vmatpush3.msra.mxu1 %v332_v46 }
  0x16   :  { %504 = vmatprep.subr.mxu0 %v560_v2  ;;  %515 = vmatprep.subr.mxu1 %v560_v2 }
  0x17   :  { %505 = vmatpush3.msra.mxu0 %v244_v40  ;;  %516 = vmatpush3.msra.mxu1 %v331_v47 }
  0x18   :  { %506 = vmatprep.subr.mxu0 %v560_v2  ;;  %517 = vmatprep.subr.mxu1 %v560_v2 }
  0x19   :  { %507 = vmatpush3.msra.mxu0 %v243_v44  ;;  %518 = vmatpush3.msra.mxu1 %v330_v50 }
  0x1a   :  { %519 = vmatprep.subr.mxu1 %v560_v2 }
  0x1b   :  { %520 = vmatpush3.msra.mxu1 %v329_v53 }
  0x1c   :  { %521 = vmatprep.subr.mxu1 %v560_v2 }
  0x1d   :  { %522 = vmatpush3.msra.mxu1 %v328_v1 }
  0x1e   :  { %523 = vmatprep.subr.mxu1 %v560_v2 }
  0x1f   :  { %524 = vmatpush3.msra.mxu1 %v327_v3 }
  0x20   :  { %525 = vmatprep.subr.mxu1 %v560_v2 }
  0x21   :  { %526 = vmatpush3.msra.mxu1 %v326_v4 }
  0xce   :  { %v104_v17 = vpop.f32.mrf.mxu0 }
  0xd0   :  { %v480_v18 = vpop.f32.mrf.mxu0 }
  0xd1   :  { %v178_v19 = vpop.f32.mrf.mxu1 }
  0xd2   :  { %v179_v21 = vadd.f32 %v178_v19, %v104_v17 }
  0xd3   :  { %v499_v22 = vpop.f32.mrf.mxu1 }
  0xd4   :  { %v187_v23 = vadd.f32 %v429_v20, %v179_v21 }
  0xd6   :  { %216 = vrot.lane.b32.xlu0 %v187_v23, %s562_s21  ;;  %v191_v30 = vsel %vm190_vm3, %v187_v23, 0.0 }
 0x148   :  { %v217_v24 = vpop.permute.xlu0 %216 }
 0x149   :  { %v219_v25 = vsel %vm190_vm3, %v217_v24, 0.0 }
 0x14a   :  { %220 = vadd.xlane.f32.xlu0 %v219_v25 }
 0x1d3   :  { %v221_v26 = vpop.xlane.xlu0 %220 }
 0x1d4   :  { %v222_v27 = vmul.f32 0.03125, %v221_v26 }
 0x1d6   :  { %v223_v28 = vsub.f32 %v187_v23, %v222_v27 }
 0x1d8   :  { %v224_v29 = vmul.f32 %v223_v28, %v223_v28 }
 0x1da   :  { %226 = vrot.lane.b32.xlu1 %v224_v29, %s562_s21 }
 0x1fe   :  { %192 = vadd.xlane.f32.xlu1 %v191_v30 }
 0x24c   :  { %v227_v31 = vpop.permute.xlu1 %226 }
 0x24d   :  { %v229_v32 = vsel %vm190_vm3, %v227_v31, 0.0 }
 0x24e   :  { %230 = vadd.xlane.f32.xlu0 %v229_v32 }
 0x287   :  { %v193_v33 = vpop.xlane.xlu1 %192 }
 0x288   :  { %v195_v34 = vmul.f32 0.03125, %v193_v33 }
 0x28a   :  { %v196_v35 = vsub.f32 %v187_v23, %v195_v34 }
 0x28c   :  { %v197_v36 = vmul.f32 %v196_v35, %v196_v35 }
 0x28e   :  { %v198_v37 = vsel %vm190_vm3, %v197_v36, 0.0 }
 0x28f   :  { %199 = vadd.xlane.f32.xlu0 %v198_v37 }
 0x2d7   :  { %v231_v41 = vpop.xlane.xlu0 %230 }
 0x2d8   :  { %v232_v42 = vmul.f32 0.03125, %v231_v41 }
 0x2da   :  { %v233_v43 = vadd.f32 1e-05, %v232_v42 }
 0x2dc   :  { %534 = vrsqrt.f32 %v233_v43 }
 0x2e9   :  { %v535_v48 = vpop.eup %534 }
 0x2ea   :  { %v235_v51 = vmul.f32 %v535_v48, %v223_v28 }
 0x2ec   :  { %v236_v54 = vmul.f32 %v430_v49, %v235_v51 }
 0x2ee   :  { %v237_v55 = vadd.f32 %v431_v52, %v236_v54 }
 0x2f0   :  { %239 = vrot.lane.b32.xlu1 %v237_v55, %s562_s21 }
 0x318   :  { %v200_v56 = vpop.xlane.xlu0 %199 }
 0x319   :  { %v201_v57 = vmul.f32 0.03125, %v200_v56 }
 0x31b   :  { %v202_v58 = vadd.f32 1e-05, %v201_v57 }
 0x31d   :  { %536 = vrsqrt.f32 %v202_v58 }
 0x32a   :  { %v537_v59 = vpop.eup %536 }
 0x32b   :  { %v204_v60 = vmul.f32 %v537_v59, %v196_v35 }
 0x32d   :  { %v209_v61 = vmul.f32 %v430_v49, %v204_v60 }
 0x32f   :  { %v214_v62 = vadd.f32 %v431_v52, %v209_v61 }
 0x362   :  { %v240_v63 = vpop.permute.xlu1 %239 }
 0x363   :  { %v242_v0 = vadd.f32 %v240_v63, %v214_v62 }
 0x365   :  { %509 = vmatmul.mubr.msk.f32.vlgmr.msra.gmra.mxu0 %vm190_vm3, %v242_v0 }
 0x425   :  { %v321_v6 = vpop.f32.mrf.mxu0 }
 0x426   :  { %v322_v7 = vadd.f32 %v432_v5, %v321_v6 }
 0x427   :  { %v510_v8 = vpop.f32.mrf.mxu0 }
 0x428   :  { %v325_v9 = vmax.f32 %v322_v7, 0.0 }
 0x42a   :  { %528 = vmatmul.mubr.msk.f32.vlgmr.msra.gmra.mxu1 %vm108_vm2, %v325_v9 }
 0x4ea   :  { %v408_v2 = vpop.f32.mrf.mxu1 }
 0x4eb   :  { %v409_v11 = vadd.f32 %v434_v10, %v408_v2 }
 0x4ec   :  { %v529_v12 = vpop.f32.mrf.mxu1 }
 0x4ed   :  { %412 = vst.msk [vmem:[#allocation2] sm:$0xff] %vm190_vm3, %v409_v11 }
 0x4ee   :  { %549 = shalt.err (!%p546_p4)
}
 0x4ef   :  { %422 = dma.vmem_to_hbm [thread:$0]  %s420_s27, 128, %s736_s4, [#allocation3]  }
 0x4f0   :  { %558 = dma.done.wait [#allocation3], 128  }
 0x4f1   :  { %559 = vsyncadd [#allocation3], 4294967168 }
 0x4f2   :  { %426 = vsyncpa [#allocation3], 1 }

</bundles_post_ra>
